<compile_context>
chip_gen: v7x
topology: tpu7x:2x2x1
jax: 0.10.0
libtpu: 0.0.40
codegen_flags: <defaults>
</compile_context>

<pallas_src>
import jax
import jax.numpy as jnp
import numpy as np
from jax.experimental import pallas as pl
from jax.experimental.pallas import tpu as pltpu

# --- problem sizes (small, consistent with the module's forward) ---
B = 8          # batch size (must be even)
HALF = B // 2
D = 32         # state feature dim
H = 32         # hidden width of the flow MLPs
C = 3          # number of federated clients
T = 6          # rollout length (number of environment steps)
H4 = H * (C + 1)   # stacked hidden width = 128 (lane-dense)


def federated_gfn_kernel(sf_ref, sb_ref, w1f_ref, w1b_ref, r2f_ref, r2b_ref,
                         out_ref):
    # One matmul per direction over all T*B rows: (48, 32) @ (32, 128).
    hf = jnp.tanh(jnp.dot(sf_ref[...], w1f_ref[...],
                          preferred_element_type=jnp.float32))   # (T*B, 128)
    hb = jnp.tanh(jnp.dot(sb_ref[...], w1b_ref[...],
                          preferred_element_type=jnp.float32))   # (T*B, 128)

    # Signed second layer as VPU broadcast-mul; lanes still hold the (C+1)
    # separate flow heads, summed later by the lane reduction.
    v = hf * r2f_ref[...] + hb * r2b_ref[...]                    # (T*B, 128)

    # Sum the residual over time: T static, 8-sublane-aligned slices.
    acc = v[0:B, :]
    for t in range(1, T):
        acc = acc + v[t * B:(t + 1) * B, :]                      # (B, 128)

    # Lane reduction -> per-example accumulated residual.
    w = jnp.sum(acc, axis=1, keepdims=True)                      # (B, 1)

    # Half-batch contrast done exactly once, then mean of squares.
    d = w[HALF:, :] - w[:HALF, :]                                # (HALF, 1)
    out_ref[...] = jnp.sum(d * d, keepdims=True) / HALF          # (1, 1)


def federated_gfn_loss(states_f, states_b, params):
    w1f, w2f, w1b, w2b, w1fc, w2fc, w1bc, w2bc = params

    # Stack layer-1 weights lane-dense: (D, H*(C+1)) = (32, 128).
    W1f = jnp.concatenate([w1f] + [w1fc[i] for i in range(C)], axis=1)
    W1b = jnp.concatenate([w1b] + [w1bc[i] for i in range(C)], axis=1)

    # Signed stacked layer-2 rows (1, 128):
    #   forward direction contributes (-flp + fsum) to v
    #   backward direction contributes (+blp - bsum) to v
    r2f = jnp.concatenate([-w2f] + [w2fc[i] for i in range(C)], axis=0).T
    r2b = jnp.concatenate([w2b] + [-w2bc[i] for i in range(C)], axis=0).T

    # Fold time into the matmul M-dimension (time-major row order preserved).
    sf2 = states_f.reshape(T * B, D)
    sb2 = states_b.reshape(T * B, D)

    return pl.pallas_call(
        federated_gfn_kernel,
        out_shape=jax.ShapeDtypeStruct((1, 1), jnp.float32),
        in_specs=[pl.BlockSpec(memory_space=pltpu.MemorySpace.VMEM)] * 6,
        out_specs=pl.BlockSpec(memory_space=pltpu.MemorySpace.VMEM),
    )(sf2, sb2, W1f, W1b, r2f, r2b)


def reference_loss(states_f, states_b, params):
    """Pure-JAX reference mirroring FederatedGFlowNets.forward (unstacked)."""
    w1f, w2f, w1b, w2b, w1fc, w2fc, w1bc, w2bc = params

    def mlp(s, w1, w2):
        return (jnp.tanh(s @ w1) @ w2)[:, 0]

    loss = jnp.zeros((HALF,), jnp.float32)
    for t in range(T):
        sf, sb = states_f[t], states_b[t]
        flp = mlp(sf, w1f, w2f)
        blp = mlp(sb, w1b, w2b)
        fsum = sum(mlp(sf, w1fc[i], w2fc[i]) for i in range(C))
        bsum = sum(mlp(sb, w1bc[i], w2bc[i]) for i in range(C))
        rhs = blp[HALF:] + flp[:HALF] + fsum[HALF:] + bsum[:HALF]
        lhs = blp[:HALF] + flp[HALF:] + fsum[:HALF] + bsum[HALF:]
        loss = loss + (rhs - lhs)
    return jnp.mean(loss * loss)


if __name__ == "__main__":
    key = jax.random.PRNGKey(0)
    ks = jax.random.split(key, 12)

    # Deterministic parameter init (shapes from the flow-MLP instantiation).
    scale = 0.1
    w1f = scale * jax.random.normal(ks[0], (D, H), jnp.float32)
    w2f = scale * jax.random.normal(ks[1], (H, 1), jnp.float32)
    w1b = scale * jax.random.normal(ks[2], (D, H), jnp.float32)
    w2b = scale * jax.random.normal(ks[3], (H, 1), jnp.float32)
    w1fc = scale * jax.random.normal(ks[4], (C, D, H), jnp.float32)
    w2fc = scale * jax.random.normal(ks[5], (C, H, 1), jnp.float32)
    w1bc = scale * jax.random.normal(ks[6], (C, D, H), jnp.float32)
    w2bc = scale * jax.random.normal(ks[7], (C, H, 1), jnp.float32)
    # Note: the base GFlowNet also owns an (unused here) log_partition_function
    # scalar parameter; it does not enter FederatedGFlowNets.forward.
    _log_Z = jax.random.normal(ks[8], ())

    params = (w1f, w2f, w1b, w2b, w1fc, w2fc, w1bc, w2bc)

    # Synthetic fixed-length trajectories: pre-apply (forward flows) and
    # post-apply (backward flows) state features, time-major (T, B, D).
    states_f = jax.random.normal(ks[9], (T, B, D), jnp.float32)
    states_b = states_f + 0.5 * jax.random.normal(ks[10], (T, B, D), jnp.float32)

    out = federated_gfn_loss(states_f, states_b, params)
    out = jax.block_until_ready(out)
    loss_kernel = float(out[0, 0])

    loss_ref = float(jax.block_until_ready(
        reference_loss(states_f, states_b, params)))

    assert np.isfinite(loss_kernel), "kernel produced non-finite loss"
    assert np.allclose(loss_kernel, loss_ref, rtol=2e-2, atol=2e-2), (
        f"mismatch: kernel={loss_kernel} ref={loss_ref}")

    print("KERNEL_OK")
</pallas_src>

<mosaic_0001>
module attributes {stable_mosaic.version = 11 : i64} {
  func.func @federated_gfn_kernel(%arg0: memref<48x32xf32, #tpu.memory_space<vmem>>, %arg1: memref<48x32xf32, #tpu.memory_space<vmem>>, %arg2: memref<32x128xf32, #tpu.memory_space<vmem>>, %arg3: memref<32x128xf32, #tpu.memory_space<vmem>>, %arg4: memref<1x128xf32, #tpu.memory_space<vmem>>, %arg5: memref<1x128xf32, #tpu.memory_space<vmem>>, %arg6: memref<1x1xf32, #tpu.memory_space<vmem>>) attributes {dimension_semantics = [], scalar_prefetch = 0 : i64, scratch_operands = 0 : i64, tpu.core_type = #tpu.core_type<tc>} {
    %c0 = arith.constant 0 : index
    %c0_0 = arith.constant 0 : index
    %0 = vector.load %arg0[%c0, %c0_0] : memref<48x32xf32, #tpu.memory_space<vmem>>, vector<48x32xf32>
    %c0_1 = arith.constant 0 : index
    %c0_2 = arith.constant 0 : index
    %1 = vector.load %arg2[%c0_1, %c0_2] : memref<32x128xf32, #tpu.memory_space<vmem>>, vector<32x128xf32>
    %cst = arith.constant dense<0.000000e+00> : vector<48x128xf32>
    %2 = tpu.matmul %0, %1, %cst {dimension_numbers = #tpu.dot_dimension_numbers<[1], [0], [0], [1], [0, 0, 1, 1], [], []>} : vector<48x32xf32>, vector<32x128xf32>, vector<48x128xf32> -> vector<48x128xf32>
    %3 = math.tanh %2 : vector<48x128xf32>
    %c0_3 = arith.constant 0 : index
    %c0_4 = arith.constant 0 : index
    %4 = vector.load %arg1[%c0_3, %c0_4] : memref<48x32xf32, #tpu.memory_space<vmem>>, vector<48x32xf32>
    %c0_5 = arith.constant 0 : index
    %c0_6 = arith.constant 0 : index
    %5 = vector.load %arg3[%c0_5, %c0_6] : memref<32x128xf32, #tpu.memory_space<vmem>>, vector<32x128xf32>
    %cst_7 = arith.constant dense<0.000000e+00> : vector<48x128xf32>
    %6 = tpu.matmul %4, %5, %cst_7 {dimension_numbers = #tpu.dot_dimension_numbers<[1], [0], [0], [1], [0, 0, 1, 1], [], []>} : vector<48x32xf32>, vector<32x128xf32>, vector<48x128xf32> -> vector<48x128xf32>
    %7 = math.tanh %6 : vector<48x128xf32>
    %c0_8 = arith.constant 0 : index
    %c0_9 = arith.constant 0 : index
    %8 = vector.load %arg4[%c0_8, %c0_9] : memref<1x128xf32, #tpu.memory_space<vmem>>, vector<1x128xf32>
    %9 = vector.broadcast %8 : vector<1x128xf32> to vector<48x128xf32>
    %10 = arith.mulf %3, %9 : vector<48x128xf32>
    %c0_10 = arith.constant 0 : index
    %c0_11 = arith.constant 0 : index
    %11 = vector.load %arg5[%c0_10, %c0_11] : memref<1x128xf32, #tpu.memory_space<vmem>>, vector<1x128xf32>
    %12 = vector.broadcast %11 : vector<1x128xf32> to vector<48x128xf32>
    %13 = arith.mulf %7, %12 : vector<48x128xf32>
    %14 = arith.addf %10, %13 : vector<48x128xf32>
    %15 = vector.extract_strided_slice %14 {offsets = [0, 0], sizes = [8, 128], strides = [1, 1]} : vector<48x128xf32> to vector<8x128xf32>
    %16 = vector.extract_strided_slice %14 {offsets = [8, 0], sizes = [8, 128], strides = [1, 1]} : vector<48x128xf32> to vector<8x128xf32>
    %17 = arith.addf %15, %16 : vector<8x128xf32>
    %18 = vector.extract_strided_slice %14 {offsets = [16, 0], sizes = [8, 128], strides = [1, 1]} : vector<48x128xf32> to vector<8x128xf32>
    %19 = arith.addf %17, %18 : vector<8x128xf32>
    %20 = vector.extract_strided_slice %14 {offsets = [24, 0], sizes = [8, 128], strides = [1, 1]} : vector<48x128xf32> to vector<8x128xf32>
    %21 = arith.addf %19, %20 : vector<8x128xf32>
    %22 = vector.extract_strided_slice %14 {offsets = [32, 0], sizes = [8, 128], strides = [1, 1]} : vector<48x128xf32> to vector<8x128xf32>
    %23 = arith.addf %21, %22 : vector<8x128xf32>
    %24 = vector.extract_strided_slice %14 {offsets = [40, 0], sizes = [8, 128], strides = [1, 1]} : vector<48x128xf32> to vector<8x128xf32>
    %25 = arith.addf %23, %24 : vector<8x128xf32>
    %cst_12 = arith.constant dense<0.000000e+00> : vector<8xf32>
    %26 = vector.multi_reduction <add>, %25, %cst_12 [1] : vector<8x128xf32> to vector<8xf32>
    %27 = vector.shape_cast %26 : vector<8xf32> to vector<8x1xf32>
    %28 = vector.extract_strided_slice %27 {offsets = [4, 0], sizes = [4, 1], strides = [1, 1]} : vector<8x1xf32> to vector<4x1xf32>
    %29 = vector.extract_strided_slice %27 {offsets = [0, 0], sizes = [4, 1], strides = [1, 1]} : vector<8x1xf32> to vector<4x1xf32>
    %30 = arith.subf %28, %29 : vector<4x1xf32>
    %31 = arith.mulf %30, %30 : vector<4x1xf32>
    %32 = vector.shape_cast %31 : vector<4x1xf32> to vector<1x4x1xf32>
    %cst_13 = arith.constant dense<0.000000e+00> : vector<1xf32>
    %33 = vector.multi_reduction <add>, %32, %cst_13 [1, 2] : vector<1x4x1xf32> to vector<1xf32>
    %34 = vector.shape_cast %33 : vector<1xf32> to vector<1x1x1xf32>
    %35 = vector.extract %34[0, 0, 0] : f32 from vector<1x1x1xf32>
    %36 = vector.broadcast %35 : f32 to vector<1x1xf32>
    %cst_14 = arith.constant 4.000000e+00 : f32
    %37 = vector.broadcast %cst_14 : f32 to vector<1x1xf32>
    %38 = arith.divf %36, %37 : vector<1x1xf32>
    %c0_15 = arith.constant 0 : index
    %c0_16 = arith.constant 0 : index
    %39 = vector.load %arg6[%c0_15, %c0_16] : memref<1x1xf32, #tpu.memory_space<vmem>>, vector<1x1xf32>
    tpu.vector_store %arg6[%c0_15, %c0_16], %38 {strides = array<i32>} : memref<1x1xf32, #tpu.memory_space<vmem>>, vector<1x1xf32>,
    return
  }
}

</mosaic_0001>

<bundles_post_ra>
// kernel: tpu_custom_call.1
= control target key start
LH: loop header
LB: loop body
LE: loop exit
PB: predicated region body
PF: predicated region fallthrough
CT: control target
= control target key end

     0   :  { %vm34_vm0 = vcmask 261120   ;;  %s621_s0 = inlined_call_operand.vmem [shape: f32[48,32], index: 0, kind: input, shape index: {}]   ;;  %s622_s1 = inlined_call_operand.vmem [shape: f32[48,32], index: 1, kind: input, shape index: {}]   ;;  %s623_s2 = inlined_call_operand.vmem [shape: f32[32,128], index: 2, kind: input, shape index: {}]   ;;  %s624_s3 = inlined_call_operand.vmem [shape: f32[32,128], index: 3, kind: input, shape index: {}]   ;;  %s625_s4 = inlined_call_operand.vmem [shape: f32[1,128], index: 4, kind: input, shape index: {}]   ;;  %s626_s5 = inlined_call_operand.vmem [shape: f32[1,128], index: 5, kind: input, shape index: {}]   ;;  %s627_s6 = inlined_call_operand.hbm [shape: f32[1,1], index: 6, kind: output, shape index: {}]  }
   0x1   :  { %v30_v0 = vld [vmem:[%s623_s2] sm:$0xff]  ;;  %v31_v1 = vld [vmem:[%s623_s2 + $0x8] sm:$0xff]  ;;  %v32_v5 = vld [vmem:[%s623_s2 + $0x10] sm:$0xff] }
   0x2   :  { %v160_v2 = vld [vmem:[%s624_s3] sm:$0xff]  ;;  %v428_v3 = vpack.c.bf16 %v31_v1, %v30_v0  ;;  %v161_v4 = vld [vmem:[%s624_s3 + $0x8] sm:$0xff]  ;;  %v33_v6 = vld [vmem:[%s623_s2 + $0x18] sm:$0xff] }
   0x3   :  { %v436_v7 = vpack.c.bf16 %v161_v4, %v160_v2  ;;  %v432_v8 = vpack.c.bf16 %v33_v6, %v32_v5  ;;  %v162_v9 = vld [vmem:[%s624_s3 + $0x10] sm:$0xff]  ;;  %v163_v10 = vld [vmem:[%s624_s3 + $0x18] sm:$0xff]  ;;  %v24_v11 = vld [vmem:[%s621_s0] sm:$0xff] }
   0x4   :  { %429 = vmatprep.subr.bf16.mxu0 %v428_v3  ;;  %v440_v12 = vpack.c.bf16 %v163_v10, %v162_v9  ;;  %402 = vmatprep.mubr.msk.f32.mxu0 %vm34_vm0, %v24_v11  ;;  %v154_v13 = vld [vmem:[%s622_s1] sm:$0xff] }
   0x5   :  { %437 = vmatprep.subr.bf16.mxu1 %v436_v7  ;;  %431 = vmatpush3.bf16.msra.mxu0 %v428_v3 }
   0x6   :  { %439 = vmatpush3.bf16.msra.mxu1 %v436_v7  ;;  %433 = vmatprep.subr.bf16.mxu0 %v432_v8 }
   0x7   :  { %441 = vmatprep.subr.bf16.mxu1 %v440_v12  ;;  %419 = vmatprep.mubr.msk.f32.mxu1 %vm34_vm0, %v154_v13 }
   0x8   :  { %11 = vsyncpa [#allocation3], 0  ;;  %v25_v14 = vld [vmem:[%s621_s0 + $0x8] sm:$0xff]  ;;  %v26_v16 = vld [vmem:[%s621_s0 + $0x10] sm:$0xff]  ;;  %vm330_vm1 = vcmask 3072   ;;  %vm344_vm2 = vcmask 0  }
   0x9   :  { %435 = vmatpush3.bf16.msra.mxu0 %v432_v8  ;;  %v155_v15 = vld [vmem:[%s622_s1 + $0x8] sm:$0xff]  ;;  %v156_v17 = vld [vmem:[%s622_s1 + $0x10] sm:$0xff]  ;;  %v27_v18 = vld [vmem:[%s621_s0 + $0x18] sm:$0xff] }
   0xa   :  { %443 = vmatpush3.bf16.msra.mxu1 %v440_v12  ;;  %v157_v19 = vld [vmem:[%s622_s1 + $0x18] sm:$0xff]  ;;  %v28_v20 = vld [vmem:[%s621_s0 + $0x20] sm:$0xff]  ;;  %v29_v22 = vld [vmem:[%s621_s0 + $0x28] sm:$0xff] }
   0xb   :  { %v158_v21 = vld [vmem:[%s622_s1 + $0x20] sm:$0xff]  ;;  %v159_v23 = vld [vmem:[%s622_s1 + $0x28] sm:$0xff] }
   0xc   :  { %403 = vmatmul.mubr.msk.f32.vlgmr.msra.gmra.mrb[0].mxu0 %vm34_vm0, %v25_v14  ;;  %v372_v33 = vld [vmem:[%s625_s4] ss:$0 sm:$0xff]  ;;  %s495_s4 = smov [#allocation2]  }
   0xd   :  { %420 = vmatmul.mubr.msk.f32.vlgmr.msra.gmra.mrb[0].mxu1 %vm34_vm0, %v155_v15  ;;  %405 = vmatprep.mubr.msk.f32.mxu0 %vm34_vm0, %v26_v16  ;;  %v373_v36 = vld [vmem:[%s626_s5] ss:$0 sm:$0xff]  ;;  %s352_s5 = sshll.u32 %s495_s4, 4  ;;  %s353_s5 = int_to_ptr.vmem [resolvable:$true] %s352_s5 }
   0xe   :  { %422 = vmatprep.mubr.msk.f32.mxu1 %vm34_vm0, %v156_v17  ;;  %s471_s14 = scalar_lea.vmem %s353_s5, 16  ;;  %s475_s15 = scalar_lea.vmem %s353_s5, 32 }
   0xf   :  { %p472_p0 = scmp.ne.s32.totalorder %s353_s5, %s471_s14  ;;  %p476_p1 = scmp.lt.s32.totalorder %s353_s5, %s353_s5 }
  0x10   :  { %406 = vmatmul.mubr.msk.f32.gmra.mrb[2].mxu0 %vm34_vm0, %v27_v18  ;;  %p477_p2 = scmp.lt.s32.totalorder %s475_s15, %s471_s14 }
  0x11   :  { %423 = vmatmul.mubr.msk.f32.gmra.mrb[2].mxu1 %vm34_vm0, %v157_v19  ;;  %408 = vmatprep.mubr.msk.f32.mxu0 %vm34_vm0, %v28_v20 }
  0x12   :  { %425 = vmatprep.mubr.msk.f32.mxu1 %vm34_vm0, %v158_v21  ;;  %p478_p3 = por %p477_p2, %p476_p1 }
  0x14   :  { %409 = vmatmul.mubr.msk.f32.gmra.mrb[4].mxu0 %vm34_vm0, %v29_v22  ;;  %p479_p4 = pnand %p478_p3, %p472_p0 }
  0x15   :  { %426 = vmatmul.mubr.msk.f32.gmra.mrb[4].mxu1 %vm34_vm0, %v159_v23 }
  0xdf   :  { %v404_v24 = vpop.f32.mrb[0].mxu0 }
  0xe0   :  { %447 = vtanh.f32 %v404_v24  ;;  %v421_v25 = vpop.f32.mrb[0].mxu1  ;;  %v119_v26 = vpop.f32.mrb[1].mxu0 }
  0xe1   :  { %449 = vtanh.f32 %v421_v25  ;;  %v248_v27 = vpop.f32.mrb[1].mxu1 }
  0xe2   :  { %451 = vtanh.f32 %v119_v26 }
  0xe3   :  { %453 = vtanh.f32 %v248_v27  ;;  %v407_v28 = vpop.f32.mrb[2].mxu0 }
  0xe4   :  { %455 = vtanh.f32 %v407_v28  ;;  %v424_v29 = vpop.f32.mrb[2].mxu1  ;;  %v129_v30 = vpop.f32.mrb[3].mxu0 }
  0xe5   :  { %457 = vtanh.f32 %v424_v29  ;;  %v258_v31 = vpop.f32.mrb[3].mxu1 }
  0xe6   :  { %459 = vtanh.f32 %v129_v30 }
  0xe7   :  { %461 = vtanh.f32 %v258_v31  ;;  %v410_v32 = vpop.f32.mrb[4].mxu0 }
  0xe8   :  { %463 = vtanh.f32 %v410_v32  ;;  %v427_v34 = vpop.f32.mrb[4].mxu1  ;;  %v139_v35 = vpop.f32.mrb[5].mxu0 }
  0xe9   :  { %465 = vtanh.f32 %v427_v34  ;;  %v268_v37 = vpop.f32.mrb[5].mxu1 }
  0xea   :  { %v448_v38 = vpop.eup %447  ;;  %467 = vtanh.f32 %v139_v35 }
  0xeb   :  { %v450_v39 = vpop.eup %449  ;;  %v291_v40 = vmul.f32 %v448_v38, %v372_v33  ;;  %469 = vtanh.f32 %v268_v37 }
  0xec   :  { %v452_v41 = vpop.eup %451  ;;  %v304_v42 = vmul.f32 %v450_v39, %v373_v36 }
  0xed   :  { %v454_v43 = vpop.eup %453  ;;  %v290_v44 = vmul.f32 %v452_v41, %v372_v33 }
  0xee   :  { %v456_v45 = vpop.eup %455  ;;  %v303_v46 = vmul.f32 %v454_v43, %v373_v36  ;;  %v310_v47 = vadd.f32 %v304_v42, %v291_v40 }
  0xef   :  { %v458_v48 = vpop.eup %457  ;;  %v293_v49 = vmul.f32 %v456_v45, %v372_v33 }
  0xf0   :  { %v460_v50 = vpop.eup %459  ;;  %v306_v51 = vmul.f32 %v458_v48, %v373_v36  ;;  %v309_v52 = vadd.f32 %v303_v46, %v290_v44 }
  0xf1   :  { %v462_v53 = vpop.eup %461  ;;  %v292_v54 = vmul.f32 %v460_v50, %v372_v33 }
  0xf2   :  { %v464_v55 = vpop.eup %463  ;;  %v305_v56 = vmul.f32 %v462_v53, %v373_v36  ;;  %v312_v57 = vadd.f32 %v306_v51, %v293_v49  ;;  %v315_v58 = vadd.f32 %v310_v47, %v309_v52 }
  0xf3   :  { %v466_v59 = vpop.eup %465  ;;  %v295_v60 = vmul.f32 %v464_v55, %v372_v33 }
  0xf4   :  { %v468_v61 = vpop.eup %467  ;;  %v308_v62 = vmul.f32 %v466_v59, %v373_v36  ;;  %v311_v63 = vadd.f32 %v305_v56, %v292_v54 }
  0xf5   :  { %v470_v0 = vpop.eup %469  ;;  %v294_v1 = vmul.f32 %v468_v61, %v372_v33 }
  0xf6   :  { %v307_v2 = vmul.f32 %v470_v0, %v373_v36  ;;  %v314_v3 = vadd.f32 %v308_v62, %v295_v60  ;;  %v316_v4 = vadd.f32 %v315_v58, %v311_v63 }
  0xf8   :  { %v313_v5 = vadd.f32 %v307_v2, %v294_v1  ;;  %v317_v6 = vadd.f32 %v316_v4, %v312_v57 }
  0xfa   :  { %v318_v7 = vadd.f32 %v317_v6, %v313_v5 }
  0xfc   :  { %v319_v8 = vadd.f32 %v318_v7, %v314_v3 }
  0xfe   :  { %320 = vadd.xlane.f32.xlu0 %v319_v8 }
 0x18b   :  { %v321_v9 = vpop.xlane.xlu0 %320 }
 0x18c   :  { %v323_v10 = vrot.slane %v321_v9, 4 }
 0x18e   :  { %v325_v11 = vsub.f32 %v321_v9, %v323_v10 }
 0x190   :  { %v326_v12 = vmul.f32 %v325_v11, %v325_v11 }
 0x192   :  { %v328_v13 = vrot.slane %v326_v12, 4 }
 0x194   :  { %v331_v14 = vsel %vm330_vm1, %v328_v13, 0.0 }
 0x195   :  { %332 = vadd.xlane.f32.xlu0 %v331_v14 }
 0x222   :  { %v333_v15 = vpop.xlane.xlu0 %332 }
 0x223   :  { %v334_v16 = vrot.slane %v333_v15, 4 }
 0x225   :  { %v335_v17 = vadd.f32 %v334_v16, %v333_v15 }
 0x227   :  { %v336_v18 = vrot.slane %v335_v17, 2 }
 0x229   :  { %v337_v19 = vadd.f32 %v336_v18, %v335_v17 }
 0x22b   :  { %v338_v20 = vrot.slane %v337_v19, 1 }
 0x22d   :  { %v339_v21 = vadd.f32 %v338_v20, %v337_v19 }
 0x22f   :  { %444 = vpush %v339_v21 }
 0x260   :  { %s445_s13 = spop %444 }
 0x261   :  { %v341_v22 = vstv %s445_s13 }
 0x262   :  { %v343_v23 = vmul.f32 0.25, %v341_v22 }
 0x264   :  { %345 = vst.msk [vmem:[#allocation2] sm:$0x1] %vm344_vm2, %v343_v23 }
 0x265   :  { %482 = shalt.err (!%p479_p4)
}
 0x266   :  { %s483_s16 = scalar_lea.hbm %s627_s6, 16 }
 0x267   :  { %p484_p5 = scmp.ne.s32.totalorder %s627_s6, %s483_s16  ;;  %p487_p6 = scmp.lt.u32.totalorder %s483_s16, %s627_s6 }
 0x269   :  { %p489_p7 = pnand %p487_p6, %p484_p5 }
 0x26b   :  { %492 = shalt.err (!%p489_p7)
}
 0x26c   :  { %355 = dma.vmem_to_hbm [thread:$0]  %s353_s5, 16, %s627_s6, [#allocation3]  }
 0x26d   :  { %493 = dma.done.wait [#allocation3], 16  }
 0x26e   :  { %494 = vsyncadd [#allocation3], 4294967280 }
 0x26f   :  { %359 = vsyncpa [#allocation3], 1 }

</bundles_post_ra>
